<compile_context>
chip_gen: v5e
topology: v5e:2x2
jax: 0.10.0
libtpu: 0.0.40
codegen_flags: <defaults>
</compile_context>

<pallas_src>
import functools

import jax
import jax.numpy as jnp
from jax.experimental import pallas as pl
from jax.experimental.pallas import tpu as pltpu


def _round_up(x: int, m: int) -> int:
    return ((x + m - 1) // m) * m


# ---------------------------------------------------------------------------
# Parameter init (deterministic stand-ins for the torch initializers)
# ---------------------------------------------------------------------------
def _orthogonal(key, rows, cols, gain):
    """Deterministic orthogonal init (like th.nn.init.orthogonal_)."""
    a = jax.random.normal(key, (max(rows, cols), min(rows, cols)), dtype=jnp.float32)
    q, r = jnp.linalg.qr(a)
    q = q * jnp.sign(jnp.diagonal(r))[None, :]
    if rows < cols:
        q = q.T
    return gain * q[:rows, :cols]


def _uniform_like_torch_linear(key, fan_in, shape):
    """Stand-in for PyTorch's default Linear init (uniform in +-1/sqrt(fan_in))."""
    bound = 1.0 / jnp.sqrt(jnp.float32(fan_in))
    return jax.random.uniform(key, shape, minval=-bound, maxval=bound, dtype=jnp.float32)


def init_actor_sac_params(key, state_dim, net_dims, action_dim):
    h1, h2 = net_dims
    k = jax.random.split(key, 6)
    # net_s layer 1 / 2 (weights stored pre-transposed: (in, out))
    w1 = _uniform_like_torch_linear(k[0], state_dim, (state_dim, h1))
    b1 = _uniform_like_torch_linear(k[1], state_dim, (1, h1))
    w2 = _uniform_like_torch_linear(k[2], h1, (h1, h2))
    b2 = _uniform_like_torch_linear(k[3], h1, (1, h2))
    # net_a output layer: orthogonal(std=0.1), bias = 1e-6  (full 2*action_dim, as in torch)
    wa = _orthogonal(k[4], action_dim * 2, h2, gain=0.1).T          # (h2, 2*action_dim)
    ba = jnp.full((1, action_dim * 2), 1e-6, dtype=jnp.float32)
    return dict(w1=w1, b1=b1, w2=w2, b2=b2, wa=wa, ba=ba)


# ---------------------------------------------------------------------------
# Host-side packing: one lane-dense parameter buffer, static aligned offsets
# ---------------------------------------------------------------------------
def pack_actor_sac_params(params, action_dim, dtype=jnp.float32):
    """Pack weights/biases into one zero-padded, MXU-friendly buffer.

    Row layout (lane width LW = multiple of 128; SDP = state_dim rounded to 8):
      [0,        SDP)       : W1  (state_dim, h1)    -> padded (SDP, LW)
      [SDP,      SDP+LW)    : W2  (h1, h2)           -> padded (LW,  LW)
      [SDP+LW,   SDP+2LW)   : WA  (h2, action_dim)   -> padded (LW,  LW)  (a_avg half only)
      [SDP+2LW,  SDP+2LW+8) : biases b1 / b2 / ba in rows +0 / +1 / +2 (one 8-sublane tile)
    Zero padding keeps the math exact: padded columns stay 0 through ReLU/tanh.
    `dtype=jnp.bfloat16` gives the bf16 dot-operand path for v6e/v7x.
    """
    w1, b1, w2, b2 = params["w1"], params["b1"], params["w2"], params["b2"]
    wa = params["wa"][:, :action_dim]      # a_avg half only
    ba = params["ba"][:, :action_dim]
    state_dim, h1 = w1.shape
    h2 = w2.shape[1]

    sdp = _round_up(state_dim, 8)
    lw = max(_round_up(h1, 128), _round_up(h2, 128), _round_up(action_dim, 128))
    total_rows = sdp + 2 * lw + 8

    buf = jnp.zeros((total_rows, lw), jnp.float32)
    buf = buf.at[:state_dim, :h1].set(w1)
    buf = buf.at[sdp:sdp + h1, :h2].set(w2)
    buf = buf.at[sdp + lw:sdp + lw + h2, :action_dim].set(wa)
    ob = sdp + 2 * lw
    buf = buf.at[ob + 0, :h1].set(b1[0])
    buf = buf.at[ob + 1, :h2].set(b2[0])
    buf = buf.at[ob + 2, :action_dim].set(ba[0])

    meta = dict(state_dim=state_dim, sdp=sdp, lw=lw, total_rows=total_rows,
                action_dim=action_dim)
    return buf.astype(dtype), meta


# ---------------------------------------------------------------------------
# Kernel
# ---------------------------------------------------------------------------
def _actor_sac_kernel(s_ref, p_ref, out_ref, *, sdp, lw, action_dim):
    ob = sdp + 2 * lw                             # start of the bias tile
    wdtype = p_ref.dtype

    x = s_ref[...]                                # (tile_b, SDP), same dtype as params
    w1 = p_ref[0:sdp, :]                          # (SDP, LW)
    w2 = p_ref[sdp:sdp + lw, :]                   # (LW, LW)
    wa = p_ref[sdp + lw:sdp + 2 * lw, :]          # (LW, LW)  (a_avg columns + zero pad)
    bias = p_ref[ob:ob + 8, :].astype(jnp.float32)  # one (8, LW) tile: b1/b2/ba in rows 0/1/2
    b1 = bias[0:1, :]
    b2 = bias[1:2, :]
    ba = bias[2:3, :]

    # MXU dots accumulate in f32; all element-wise math (bias add / ReLU / tanh)
    # stays in f32 (v5e VPU/EUP have no bf16 path).
    h = jnp.maximum(jnp.dot(x, w1, preferred_element_type=jnp.float32) + b1, 0.0)
    h = jnp.maximum(jnp.dot(h.astype(wdtype), w2, preferred_element_type=jnp.float32) + b2, 0.0)
    a = jnp.dot(h.astype(wdtype), wa, preferred_element_type=jnp.float32) + ba
    # Narrow store: only the action_dim real lanes ever hit HBM (no 16x write
    # amplification, no wrapper slice re-read).
    out_ref[...] = jnp.tanh(a[:, :action_dim]).astype(out_ref.dtype)


# ---------------------------------------------------------------------------
# Wrapper
# ---------------------------------------------------------------------------
def actor_sac_forward(state, packed_params, meta, action_dim, *,
                      batch_tile=2048, no_grid_max_batch=8192):
    """tanh(a_avg) for ActorSAC.forward.  Returns (B, action_dim) f32."""
    B, state_dim = state.shape
    assert state_dim == meta["state_dim"]
    assert action_dim == meta["action_dim"]
    sdp, lw, total_rows = meta["sdp"], meta["lw"], meta["total_rows"]

    x = state.astype(packed_params.dtype)
    if state_dim != sdp:                          # no-op unless state_dim % 8 != 0
        x = jnp.pad(x, ((0, 0), (0, sdp - state_dim)))

    kernel = functools.partial(_actor_sac_kernel, sdp=sdp, lw=lw, action_dim=action_dim)

    p_bytes = packed_params.size * packed_params.dtype.itemsize
    cost = pl.CostEstimate(
        flops=2 * B * lw * (sdp + 2 * lw),
        transcendentals=B * action_dim,
        bytes_accessed=B * sdp * x.dtype.itemsize + p_bytes + B * action_dim * 4,
    )
    out_shape = jax.ShapeDtypeStruct((B, action_dim), jnp.float32)

    if B <= no_grid_max_batch:
        # Small/medium batch: no grid, no pipeline — whole problem in VMEM, 2 input DMAs.
        # Working set at B=8192 is ~20 MiB (lane-padded x/h/out), under the 32 MiB default
        # scoped VMEM and well under v7x's 64 MiB physical; don't raise no_grid_max_batch
        # past ~16K on v7x.
        return pl.pallas_call(
            kernel,
            out_shape=out_shape,
            in_specs=[
                pl.BlockSpec(memory_space=pltpu.MemorySpace.VMEM),  # state
                pl.BlockSpec(memory_space=pltpu.MemorySpace.VMEM),  # packed params
            ],
            out_specs=pl.BlockSpec(memory_space=pltpu.MemorySpace.VMEM),
            compiler_params=pltpu.CompilerParams(vmem_limit_bytes=48 * 1024 * 1024),
            cost_estimate=cost,
        )(x, packed_params)

    # Large batch: big batch tiles (>=1024) so the ~0.35 us per-step overhead amortizes;
    # weights stay VMEM-resident (index_map -> (0,0)); grid sized with cdiv — the partial
    # tail block is clipped by Pallas, so no host-side jnp.pad of x. The "parallel" batch
    # axis only matters on v7x (2 TCs) and only with several grid steps.
    grid = (pl.cdiv(B, batch_tile),)
    return pl.pallas_call(
        kernel,
        out_shape=out_shape,
        grid=grid,
        in_specs=[
            pl.BlockSpec((batch_tile, sdp), lambda i: (i, 0)),      # state tile
            pl.BlockSpec((total_rows, lw), lambda i: (0, 0)),       # params resident
        ],
        out_specs=pl.BlockSpec((batch_tile, action_dim), lambda i: (i, 0)),
        compiler_params=pltpu.CompilerParams(dimension_semantics=("parallel",)),
        cost_estimate=cost,
    )(x, packed_params)


# ---------------------------------------------------------------------------
# Pure-JAX reference (uses raw, unpacked f32 params)
# ---------------------------------------------------------------------------
def actor_sac_forward_ref(state, params, action_dim):
    h = jnp.maximum(state @ params["w1"] + params["b1"], 0.0)
    h = jnp.maximum(h @ params["w2"] + params["b2"], 0.0)
    a = h @ params["wa"] + params["ba"]
    return jnp.tanh(a[:, :action_dim])


if __name__ == "__main__":
    # Small shapes consistent with the module: state_dim=16, net_dims=[32, 32], action_dim=8.
    B = 8
    STATE_DIM = 16
    NET_DIMS = [32, 32]
    ACTION_DIM = 8

    key = jax.random.PRNGKey(0)
    pkey, k1, k2 = jax.random.split(key, 3)
    params = init_actor_sac_params(pkey, STATE_DIM, NET_DIMS, ACTION_DIM)
    packed_f32, meta = pack_actor_sac_params(params, ACTION_DIM)

    # 1) Small batch -> no-grid path (f32, exact).
    state = jax.random.normal(k1, (B, STATE_DIM), dtype=jnp.float32)
    out = jax.block_until_ready(actor_sac_forward(state, packed_f32, meta, ACTION_DIM))
    ref = actor_sac_forward_ref(state, params, ACTION_DIM)
    assert out.shape == (B, ACTION_DIM)
    assert jnp.allclose(out, ref, atol=1e-5, rtol=1e-5), "small-batch mismatch vs. reference"

    # 2) Batch-tiled grid path. Small overrides just to exercise cdiv + a partial tail
    #    block (600 = 2*256 + 88); production defaults are batch_tile=2048 / no-grid<=8192.
    B2 = 600
    state2 = jax.random.normal(k2, (B2, STATE_DIM), dtype=jnp.float32)
    out2 = jax.block_until_ready(
        actor_sac_forward(state2, packed_f32, meta, ACTION_DIM,
                          batch_tile=256, no_grid_max_batch=128))
    ref2 = actor_sac_forward_ref(state2, params, ACTION_DIM)
    assert out2.shape == (B2, ACTION_DIM)
    assert jnp.allclose(out2, ref2, atol=1e-5, rtol=1e-5), "batched mismatch vs. reference"

    # 3) bf16 dot-operand path (halves state/param DMA bytes on v6e/v7x); element-wise
    #    math stays f32 in-kernel, so only matmul rounding differs -> loose tolerance.
    packed_bf16, meta_bf = pack_actor_sac_params(params, ACTION_DIM, dtype=jnp.bfloat16)
    out3 = jax.block_until_ready(actor_sac_forward(state, packed_bf16, meta_bf, ACTION_DIM))
    assert out3.shape == (B, ACTION_DIM)
    assert jnp.allclose(out3, ref, atol=3e-2, rtol=3e-2), "bf16 path mismatch vs. reference"

    print("KERNEL_OK")
</pallas_src>

<mosaic_0001>
module attributes {stable_mosaic.version = 11 : i64} {
  func.func @_actor_sac_kernel(%arg0: memref<8x16xf32, #tpu.memory_space<vmem>>, %arg1: memref<280x128xf32, #tpu.memory_space<vmem>>, %arg2: memref<8x8xf32, #tpu.memory_space<vmem>>) attributes {dimension_semantics = [], scalar_prefetch = 0 : i64, scratch_operands = 0 : i64, tpu.core_type = #tpu.core_type<tc>} {
    %c0 = arith.constant 0 : index
    %c0_0 = arith.constant 0 : index
    %0 = vector.load %arg0[%c0, %c0_0] : memref<8x16xf32, #tpu.memory_space<vmem>>, vector<8x16xf32>
    %c0_1 = arith.constant 0 : index
    %c0_2 = arith.constant 0 : index
    %1 = vector.load %arg1[%c0_1, %c0_2] : memref<280x128xf32, #tpu.memory_space<vmem>>, vector<16x128xf32>
    %c16 = arith.constant 16 : index
    %c0_3 = arith.constant 0 : index
    %2 = vector.load %arg1[%c16, %c0_3] : memref<280x128xf32, #tpu.memory_space<vmem>>, vector<128x128xf32>
    %c144 = arith.constant 144 : index
    %c0_4 = arith.constant 0 : index
    %3 = vector.load %arg1[%c144, %c0_4] : memref<280x128xf32, #tpu.memory_space<vmem>>, vector<128x128xf32>
    %c272 = arith.constant 272 : index
    %c0_5 = arith.constant 0 : index
    %4 = vector.load %arg1[%c272, %c0_5] : memref<280x128xf32, #tpu.memory_space<vmem>>, vector<8x128xf32>
    %5 = vector.extract_strided_slice %4 {offsets = [0, 0], sizes = [1, 128], strides = [1, 1]} : vector<8x128xf32> to vector<1x128xf32>
    %6 = vector.extract_strided_slice %4 {offsets = [1, 0], sizes = [1, 128], strides = [1, 1]} : vector<8x128xf32> to vector<1x128xf32>
    %7 = vector.extract_strided_slice %4 {offsets = [2, 0], sizes = [1, 128], strides = [1, 1]} : vector<8x128xf32> to vector<1x128xf32>
    %cst = arith.constant dense<0.000000e+00> : vector<8x128xf32>
    %8 = tpu.matmul %0, %1, %cst {dimension_numbers = #tpu.dot_dimension_numbers<[1], [0], [0], [1], [0, 0, 1, 1], [], []>} : vector<8x16xf32>, vector<16x128xf32>, vector<8x128xf32> -> vector<8x128xf32>
    %9 = vector.broadcast %5 : vector<1x128xf32> to vector<8x128xf32>
    %10 = arith.addf %8, %9 : vector<8x128xf32>
    %cst_6 = arith.constant 0.000000e+00 : f32
    %11 = vector.broadcast %cst_6 : f32 to vector<8x128xf32>
    %12 = arith.maximumf %10, %11 : vector<8x128xf32>
    %cst_7 = arith.constant dense<0.000000e+00> : vector<8x128xf32>
    %13 = tpu.matmul %12, %2, %cst_7 {dimension_numbers = #tpu.dot_dimension_numbers<[1], [0], [0], [1], [0, 0, 1, 1], [], []>} : vector<8x128xf32>, vector<128x128xf32>, vector<8x128xf32> -> vector<8x128xf32>
    %14 = vector.broadcast %6 : vector<1x128xf32> to vector<8x128xf32>
    %15 = arith.addf %13, %14 : vector<8x128xf32>
    %cst_8 = arith.constant 0.000000e+00 : f32
    %16 = vector.broadcast %cst_8 : f32 to vector<8x128xf32>
    %17 = arith.maximumf %15, %16 : vector<8x128xf32>
    %cst_9 = arith.constant dense<0.000000e+00> : vector<8x128xf32>
    %18 = tpu.matmul %17, %3, %cst_9 {dimension_numbers = #tpu.dot_dimension_numbers<[1], [0], [0], [1], [0, 0, 1, 1], [], []>} : vector<8x128xf32>, vector<128x128xf32>, vector<8x128xf32> -> vector<8x128xf32>
    %19 = vector.broadcast %7 : vector<1x128xf32> to vector<8x128xf32>
    %20 = arith.addf %18, %19 : vector<8x128xf32>
    %21 = vector.extract_strided_slice %20 {offsets = [0, 0], sizes = [8, 8], strides = [1, 1]} : vector<8x128xf32> to vector<8x8xf32>
    %22 = math.tanh %21 : vector<8x8xf32>
    %c0_10 = arith.constant 0 : index
    %c0_11 = arith.constant 0 : index
    %23 = vector.load %arg2[%c0_10, %c0_11] : memref<8x8xf32, #tpu.memory_space<vmem>>, vector<8x8xf32>
    tpu.vector_store %arg2[%c0_10, %c0_11], %22 {strides = array<i32>} : memref<8x8xf32, #tpu.memory_space<vmem>>, vector<8x8xf32>,
    return
  }
}

</mosaic_0001>

<bundles_post_ra>
// kernel: tpu_custom_call.1
= control target key start
LH: loop header
LB: loop body
LE: loop exit
PB: predicated region body
PF: predicated region fallthrough
CT: control target
= control target key end

     0   :  { %7 = vsyncpa [#allocation3], 0  ;;  %s283_s0 = inlined_call_operand.hbm [shape: f32[8,16], index: 0, kind: input, shape index: {}]   ;;  %s284_s1 = inlined_call_operand.hbm [shape: f32[280,128], index: 1, kind: input, shape index: {}]   ;;  %s285_s2 = inlined_call_operand.hbm [shape: f32[8,8], index: 2, kind: output, shape index: {}]  }
   0x1   :  { %8 = vsyncpa [#allocation6], 0 }
   0x2   :  { %9 = vsyncpa [#allocation4], 0  ;;  %s15_s11 = sshll.u32 %s283_s0, 4  ;;  %s254_s12 = smov [#allocation2]   ;;  %s16_s11 = int_to_ptr.hbm [resolvable:$true] %s15_s11 }
   0x3   :  { %s17_s13 = sshll.u32 %s254_s12, 4  ;;  %s25_s16 = sshll.u32 %s284_s1, 4  ;;  %s18_s13 = int_to_ptr.vmem [resolvable:$true] %s17_s13  ;;  %s26_s16 = int_to_ptr.hbm [resolvable:$true] %s25_s16 }
   0x4   :  { %20 = dma.hbm_to_vmem [thread:$0]  %s16_s11, 128, %s18_s13, [#allocation3]  }
   0x5   :  { %s255_s17 = smov [#allocation5]   ;;  %s256_s19 = smov 128  }
   0x6   :  { %s27_s18 = sshll.u32 %s255_s17, 4  ;;  %s257_s20 = smov 8   ;;  %s28_s18 = int_to_ptr.vmem [resolvable:$true] %s27_s18 }
   0x7   :  { %33 = dma.hbm_to_vmem [thread:$0]  %s26_s16, 4480, %s28_s18, [#allocation6], %s256_s19, %s256_s19, %s257_s20  }
   0x8   :  { %248 = dma.done.wait [#allocation3], 128  }
   0x9   :  { %249 = vsyncadd [#allocation3], 4294967168 }
   0xa   :  { %250 = dma.done.wait [#allocation6], 4480  }
   0xb   :  { %251 = vsyncadd [#allocation6], 4294962816  ;;  %v44_v0 = vld [vmem:[#allocation5 + $0x8] sm:$0xff]  ;;  %v43_v1 = vld [vmem:[#allocation5] sm:$0xff]  ;;  %vm79_vm0 = vcmask 130048   ;;  %s258_s0 = smov [#allocation7]  }
   0xc   :  { %97 = vmatpush.msra.mxu0 %v44_v0  ;;  %v42_v2 = vld [vmem:[#allocation2] sm:$0xff]  ;;  %v60_v3 = vld [vmem:[#allocation5 + $0x88] sm:$0xff]  ;;  %v59_v4 = vld [vmem:[#allocation5 + $0x80] sm:$0xff]  ;;  %s155_s1 = sshll.u32 %s258_s0, 4  ;;  %s157_s23 = sshll.u32 %s285_s2, 4  ;;  %vm148_vm1 = vcmask 64512   ;;  %s156_s1 = int_to_ptr.vmem [resolvable:$true] %s155_s1  ;;  %s158_s23 = int_to_ptr.hbm [resolvable:$true] %s157_s23 }
   0xd   :  { %105 = vmatpush.msra.mxu1 %v60_v3  ;;  %v58_v5 = vld [vmem:[#allocation5 + $0x78] sm:$0xff]  ;;  %v57_v6 = vld [vmem:[#allocation5 + $0x70] sm:$0xff]  ;;  %v56_v7 = vld [vmem:[#allocation5 + $0x68] sm:$0xff] }
   0xe   :  { %98 = vmatpush.msra.mxu0 %v43_v1  ;;  %v55_v8 = vld [vmem:[#allocation5 + $0x60] sm:$0xff]  ;;  %v54_v9 = vld [vmem:[#allocation5 + $0x58] sm:$0xff]  ;;  %v53_v10 = vld [vmem:[#allocation5 + $0x50] sm:$0xff] }
   0xf   :  { %168 = vmatmul.msk.f32.vlgmr.msra.gmra.mxu0 %vm79_vm0, %v42_v2  ;;  %106 = vmatpush.msra.mxu1 %v59_v4  ;;  %v52_v11 = vld [vmem:[#allocation5 + $0x48] sm:$0xff]  ;;  %v51_v12 = vld [vmem:[#allocation5 + $0x40] sm:$0xff]  ;;  %v50_v13 = vld [vmem:[#allocation5 + $0x38] sm:$0xff] }
  0x10   :  { %v49_v14 = vld [vmem:[#allocation5 + $0x30] sm:$0xff]  ;;  %v48_v15 = vld [vmem:[#allocation5 + $0x28] sm:$0xff]  ;;  %v47_v16 = vld [vmem:[#allocation5 + $0x20] sm:$0xff] }
  0x11   :  { %107 = vmatpush.msra.mxu1 %v58_v5  ;;  %v46_v17 = vld [vmem:[#allocation5 + $0x18] sm:$0xff]  ;;  %v45_v18 = vld [vmem:[#allocation5 + $0x10] sm:$0xff]  ;;  %v76_v19 = vld [vmem:[#allocation5 + $0x108] sm:$0xff] }
  0x12   :  { %v75_v20 = vld [vmem:[#allocation5 + $0x100] sm:$0xff]  ;;  %127 = vmatpush.msra.mxu2 %v76_v19  ;;  %v74_v21 = vld [vmem:[#allocation5 + $0xf8] sm:$0xff]  ;;  %v73_v22 = vld [vmem:[#allocation5 + $0xf0] sm:$0xff] }
  0x13   :  { %108 = vmatpush.msra.mxu1 %v57_v6  ;;  %v72_v23 = vld [vmem:[#allocation5 + $0xe8] sm:$0xff]  ;;  %v71_v24 = vld [vmem:[#allocation5 + $0xe0] sm:$0xff]  ;;  %v70_v25 = vld [vmem:[#allocation5 + $0xd8] sm:$0xff] }
  0x14   :  { %128 = vmatpush.msra.mxu2 %v75_v20  ;;  %v69_v26 = vld [vmem:[#allocation5 + $0xd0] sm:$0xff]  ;;  %v68_v27 = vld [vmem:[#allocation5 + $0xc8] sm:$0xff]  ;;  %v67_v28 = vld [vmem:[#allocation5 + $0xc0] sm:$0xff] }
  0x15   :  { %109 = vmatpush.msra.mxu1 %v56_v7  ;;  %v66_v29 = vld [vmem:[#allocation5 + $0xb8] sm:$0xff]  ;;  %v65_v30 = vld [vmem:[#allocation5 + $0xb0] sm:$0xff]  ;;  %v64_v32 = vld [vmem:[#allocation5 + $0xa8] sm:$0xff] }
  0x16   :  { %129 = vmatpush.msra.mxu2 %v74_v21  ;;  %v77_v31 = vld [vmem:[#allocation5 + $0x110] sm:$0xff]  ;;  %v63_v37 = vld [vmem:[#allocation5 + $0xa0] sm:$0xff]  ;;  %v62_v38 = vld [vmem:[#allocation5 + $0x98] sm:$0xff] }
  0x17   :  { %110 = vmatpush.msra.mxu1 %v55_v8  ;;  %v78_v33 = vperm.slane %v77_v31, 0  ;;  %v61_v39 = vld [vmem:[#allocation5 + $0x90] sm:$0xff]  ;;  %v104_v40 = vperm.slane %v77_v31, 1  ;;  %v126_v44 = vperm.slane %v77_v31, 2 }
  0x18   :  { %130 = vmatpush.msra.mxu2 %v73_v22 }
  0x19   :  { %111 = vmatpush.msra.mxu1 %v54_v9 }
  0x1a   :  { %131 = vmatpush.msra.mxu2 %v72_v23 }
  0x1b   :  { %112 = vmatpush.msra.mxu1 %v53_v10 }
  0x1c   :  { %132 = vmatpush.msra.mxu2 %v71_v24 }
  0x1d   :  { %113 = vmatpush.msra.mxu1 %v52_v11 }
  0x1e   :  { %133 = vmatpush.msra.mxu2 %v70_v25 }
  0x1f   :  { %114 = vmatpush.msra.mxu1 %v51_v12 }
  0x20   :  { %134 = vmatpush.msra.mxu2 %v69_v26 }
  0x21   :  { %115 = vmatpush.msra.mxu1 %v50_v13 }
  0x22   :  { %135 = vmatpush.msra.mxu2 %v68_v27 }
  0x23   :  { %116 = vmatpush.msra.mxu1 %v49_v14 }
  0x24   :  { %136 = vmatpush.msra.mxu2 %v67_v28 }
  0x25   :  { %117 = vmatpush.msra.mxu1 %v48_v15 }
  0x26   :  { %137 = vmatpush.msra.mxu2 %v66_v29 }
  0x27   :  { %118 = vmatpush.msra.mxu1 %v47_v16 }
  0x28   :  { %138 = vmatpush.msra.mxu2 %v65_v30 }
  0x29   :  { %119 = vmatpush.msra.mxu1 %v46_v17 }
  0x2a   :  { %139 = vmatpush.msra.mxu2 %v64_v32 }
  0x2b   :  { %120 = vmatpush.msra.mxu1 %v45_v18 }
  0x2c   :  { %140 = vmatpush.msra.mxu2 %v63_v37 }
  0x2e   :  { %141 = vmatpush.msra.mxu2 %v62_v38 }
  0x30   :  { %142 = vmatpush.msra.mxu2 %v61_v39 }
  0x8c   :  { %v100_v34 = vpop.f32.mrf.mxu0 }
  0x8d   :  { %v101_v35 = vadd.f32 %v100_v34, %v78_v33 }
  0x8f   :  { %v103_v36 = vmax.f32 %v101_v35, 0.0 }
  0x91   :  { %121 = vmatmul.f32.vlgmr.msra.gmra.mxu1 %v103_v36 }
 0x10e   :  { %v122_v41 = vpop.f32.mrf.mxu1 }
 0x10f   :  { %v123_v42 = vadd.f32 %v122_v41, %v104_v40 }
 0x111   :  { %v125_v43 = vmax.f32 %v123_v42, 0.0 }
 0x113   :  { %143 = vmatmul.f32.vlgmr.msra.gmra.mxu2 %v125_v43 }
 0x196   :  { %v144_v45 = vpop.f32.mrf.mxu2 }
 0x197   :  { %v145_v46 = vadd.f32 %v144_v45, %v126_v44 }
 0x199   :  { %174 = vtanh.f32 %v145_v46 }
 0x19f   :  { %v175_v47 = vpop.eup %174 }
 0x1a0   :  { %149 = vst.msk [vmem:[#allocation7] sm:$0xff] %vm148_vm1, %v175_v47 }
 0x1a1   :  { %160 = dma.vmem_to_hbm [thread:$0]  %s156_s1, 128, %s158_s23, [#allocation4]  }
 0x1a2   :  { %252 = dma.done.wait [#allocation4], 128  }
 0x1a3   :  { %253 = vsyncadd [#allocation4], 4294967168 }
 0x1a4   :  { %165 = vsyncpa [#allocation3], 1 }
 0x1a5   :  { %166 = vsyncpa [#allocation6], 1 }
 0x1a6   :  { %167 = vsyncpa [#allocation4], 1 }

</bundles_post_ra>
